<compile_context>
chip_gen: v7x
topology: tpu7x:2x2x1
jax: 0.10.0
libtpu: 0.0.40
codegen_flags: <defaults>
</compile_context>

<pallas_src>
import functools
import math

import jax
import jax.numpy as jnp
import numpy as np
from jax import lax
from jax.experimental import pallas as pl
from jax.experimental.pallas import tpu as pltpu  # noqa: F401  (production-size tiling TODO)

# Problem sizes (small, consistent with the module).
B = 2          # batch
S = 8          # sequence length (number of tokens / features)
D = 32         # embedding dim
HEADS = 4      # attention heads
FF_MULT = 4    # GLU feed-forward expansion
LN_EPS = 1e-5

# Packing layout of the coalesced small-parameter operand.
_SMALL_PARAM_NAMES = ("bqkv", "bo", "ln1_w", "ln1_b", "b1", "b2", "b3",
                      "ln2_w", "ln2_b")
_ROW_STRIDE = 8  # keep every packed param on an 8-sublane-aligned row block


def _small_param_rows():
    return {name: i * _ROW_STRIDE for i, name in enumerate(_SMALL_PARAM_NAMES)}


def transformer_block_kernel(
    x_ref,      # (N, D)        f32,  N = B*S
    wqkv_ref,   # (D, 3D)       bf16  (pre-transposed: x @ wqkv)
    wo_ref,     # (D, D)        bf16
    w1_ref,     # (D, FF)       bf16
    w2_ref,     # (D, FF)       bf16
    w3_ref,     # (FF, D)       bf16
    sp_ref,     # (R, 128)      f32   coalesced biases + LN params + mask
    o_ref,      # (N, D)        f32
    *,
    heads,
    rows,
    mask_row,
):
    x = x_ref[...]                                   # (N, D) f32
    n, d = x.shape
    hd = d // heads
    hn = heads * n
    ff = w1_ref.shape[1]
    scale = 1.0 / math.sqrt(hd)

    def small(name, width):                          # (1, width) f32, 8-aligned row
        r = rows[name]
        return sp_ref[r:r + 1, 0:width]

    bqkv = small("bqkv", 3 * d)
    bo = small("bo", d)
    ln1w, ln1b = small("ln1_w", d), small("ln1_b", d)
    b1, b2, b3 = small("b1", ff), small("b2", ff), small("b3", d)
    ln2w, ln2b = small("ln2_w", d), small("ln2_b", d)
    # Precomputed additive mask: 0 within (same head, same batch row), -1e30 else.
    mask = sp_ref[mask_row:mask_row + hn, 0:hn]      # (H*N, H*N) f32

    # --- fused QKV projection (bf16 operands, f32 accumulation) ---
    x_bf = x.astype(jnp.bfloat16)
    qkv = jnp.dot(x_bf, wqkv_ref[...], preferred_element_type=jnp.float32) + bqkv
    q, k, v = qkv[:, 0:d], qkv[:, d:2 * d], qkv[:, 2 * d:3 * d]

    # --- head-stacked attention: one score matmul, ONE softmax, one P@V ---
    q_s = jnp.concatenate([q[:, h * hd:(h + 1) * hd] for h in range(heads)], axis=0)
    k_s = jnp.concatenate([k[:, h * hd:(h + 1) * hd] for h in range(heads)], axis=0)
    v_s = jnp.concatenate([v[:, h * hd:(h + 1) * hd] for h in range(heads)], axis=0)

    s = lax.dot_general(q_s, k_s, (((1,), (1,)), ((), ())),   # q_s @ k_s^T, no vxpose
                        preferred_element_type=jnp.float32)   # (H*N, H*N)
    s = s * scale + mask
    s = s - jnp.max(s, axis=-1, keepdims=True)
    p = jnp.exp(s)                                   # masked entries underflow to 0
    p = p * pl.reciprocal(jnp.sum(p, axis=-1, keepdims=True), approx=True)
    # attention dropout == identity (eval mode)
    po = jnp.dot(p, v_s, preferred_element_type=jnp.float32)  # (H*N, hd)

    # --- output projection: accumulate per-head rows through W_o (no concat) ---
    wo = wo_ref[...]                                 # (D, D) bf16
    attn = jnp.zeros((n, d), jnp.float32)
    for h in range(heads):
        attn = attn + jnp.dot(po[h * n:(h + 1) * n, :].astype(jnp.bfloat16),
                              wo[h * hd:(h + 1) * hd, :],
                              preferred_element_type=jnp.float32)
    attn = attn + bo

    # --- residual + LayerNorm 1 (f32) ---
    y = x + attn
    mu = jnp.mean(y, axis=-1, keepdims=True)
    var = jnp.mean((y - mu) * (y - mu), axis=-1, keepdims=True)
    y = (y - mu) * lax.rsqrt(var + LN_EPS) * ln1w + ln1b

    # --- GLU feed-forward (bf16 matmul operands, f32 elementwise) ---
    y_bf = y.astype(jnp.bfloat16)
    proj = jnp.dot(y_bf, w1_ref[...], preferred_element_type=jnp.float32) + b1
    gate = jax.nn.sigmoid(
        jnp.dot(y_bf, w2_ref[...], preferred_element_type=jnp.float32) + b2)
    glu = (proj * gate).astype(jnp.bfloat16)
    ffo = jnp.dot(glu, w3_ref[...], preferred_element_type=jnp.float32) + b3
    # FF dropout == identity (eval mode)

    # --- residual + LayerNorm 2 (f32) ---
    z = y + ffo
    mu2 = jnp.mean(z, axis=-1, keepdims=True)
    var2 = jnp.mean((z - mu2) * (z - mu2), axis=-1, keepdims=True)
    z = (z - mu2) * lax.rsqrt(var2 + LN_EPS) * ln2w + ln2b

    o_ref[...] = z.astype(o_ref.dtype)


def transformer_block(x, params):
    """x: (B, S, D) float32. params: dict of weight arrays (see init_params)."""
    b, s, d = x.shape
    n = b * s
    hn = HEADS * n
    ff = FF_MULT * d
    hd = d // HEADS

    # Fold batch into the token dimension wrapper-side (free XLA reshape).
    x2 = x.reshape(n, d)

    # ---- coalesce all small params + the trace-time mask into ONE operand ----
    rows = _small_param_rows()
    mask_row = _ROW_STRIDE * len(_SMALL_PARAM_NAMES)
    width = max(128, ff, 3 * d, hn)
    width = ((width + 127) // 128) * 128
    total_rows = mask_row + hn

    sp = jnp.zeros((total_rows, width), jnp.float32)
    for name in _SMALL_PARAM_NAMES:
        vec = params[name].reshape(1, -1).astype(jnp.float32)
        sp = sp.at[rows[name]:rows[name] + 1, 0:vec.shape[1]].set(vec)

    # Block-diagonal additive mask built with numpy at trace time:
    # row (h, i) may attend to col (h', j) iff same head and same batch row.
    idx = np.arange(hn)
    head_id = idx // n
    batch_id = (idx % n) // s
    allowed = (head_id[:, None] == head_id[None, :]) & \
              (batch_id[:, None] == batch_id[None, :])
    mask_np = np.where(allowed, 0.0, -1e30).astype(np.float32)
    sp = sp.at[mask_row:mask_row + hn, 0:hn].set(jnp.asarray(mask_np))

    ordered_inputs = [x2, params["wqkv"], params["wo"], params["w1"],
                      params["w2"], params["w3"], sp]

    # Advisory cost estimate so XLA schedules neighbors around this tiny call.
    flops = (2 * n * d * (3 * d)            # QKV projection
             + 2 * hn * hn * hd * 2         # stacked QK^T + P@V (incl. masked waste)
             + 2 * n * d * d                # per-head accumulate through W_o
             + 2 * n * d * ff * 2           # fc1 + fc2
             + 2 * n * ff * d)              # fc3
    transcendentals = hn * hn + n * ff + 2 * n + hn
    bytes_accessed = int(sum(a.size * a.dtype.itemsize for a in ordered_inputs)
                         + n * d * 4)

    # No grid: single invocation, every operand a whole-array single-buffered
    # VMEM block (default specs) -> no per-operand pipeline prologue at all.
    out2 = pl.pallas_call(
        functools.partial(transformer_block_kernel,
                          heads=HEADS, rows=rows, mask_row=mask_row),
        out_shape=jax.ShapeDtypeStruct((n, d), jnp.float32),
        cost_estimate=pl.CostEstimate(flops=int(flops),
                                      transcendentals=int(transcendentals),
                                      bytes_accessed=bytes_accessed),
    )(*ordered_inputs)
    return out2.reshape(b, s, d)


def init_params(key, d, ff_mult):
    ff = ff_mult * d
    ks = jax.random.split(key, 12)
    n32 = lambda k, shape, sc=0.1: (sc * jax.random.normal(k, shape)).astype(jnp.float32)
    nbf = lambda k, shape, sc=0.1: n32(k, shape, sc).astype(jnp.bfloat16)
    return {
        # in_proj weight stored pre-transposed: (D, 3D) so kernel computes x @ W.
        "wqkv": nbf(ks[0], (d, 3 * d)),
        "bqkv": n32(ks[1], (1, 3 * d)),
        "wo":   nbf(ks[2], (d, d)),
        "bo":   n32(ks[3], (1, d)),
        "ln1_w": jnp.ones((1, d), jnp.float32) + n32(ks[4], (1, d), 0.05),
        "ln1_b": n32(ks[5], (1, d), 0.05),
        "w1":   nbf(ks[6], (d, ff)),
        "b1":   n32(ks[7], (1, ff)),
        "w2":   nbf(ks[8], (d, ff)),
        "b2":   n32(ks[9], (1, ff)),
        "w3":   nbf(ks[10], (ff, d)),
        "b3":   n32(ks[11], (1, d)),
        "ln2_w": jnp.ones((1, d), jnp.float32),
        "ln2_b": jnp.zeros((1, d), jnp.float32),
    }


def reference_forward(x, p):
    """Pure-JAX f32 reference mirroring the PyTorch module (eval mode)."""
    d = x.shape[-1]
    hd = d // HEADS
    f32 = lambda a: a.astype(jnp.float32)

    qkv = x @ f32(p["wqkv"]) + p["bqkv"][0]
    q, k, v = qkv[..., :d], qkv[..., d:2 * d], qkv[..., 2 * d:]

    def split(t):  # (B,S,D) -> (B,H,S,hd)
        return t.reshape(t.shape[0], t.shape[1], HEADS, hd).transpose(0, 2, 1, 3)

    qh, kh, vh = split(q), split(k), split(v)
    scores = jnp.einsum("bhqd,bhkd->bhqk", qh, kh) / math.sqrt(hd)
    probs = jax.nn.softmax(scores, axis=-1)
    attn = jnp.einsum("bhqk,bhkd->bhqd", probs, vh).transpose(0, 2, 1, 3).reshape(x.shape)
    attn = attn @ f32(p["wo"]) + p["bo"][0]

    def ln(t, w, b):
        mu = jnp.mean(t, -1, keepdims=True)
        var = jnp.mean((t - mu) ** 2, -1, keepdims=True)
        return (t - mu) * lax.rsqrt(var + LN_EPS) * w[0] + b[0]

    y = ln(x + attn, p["ln1_w"], p["ln1_b"])
    ffo = ((y @ f32(p["w1"]) + p["b1"][0])
           * jax.nn.sigmoid(y @ f32(p["w2"]) + p["b2"][0])) @ f32(p["w3"]) + p["b3"][0]
    return ln(y + ffo, p["ln2_w"], p["ln2_b"])


if __name__ == "__main__":
    key = jax.random.PRNGKey(0)
    kx, kp = jax.random.split(key)
    x = jax.random.normal(kx, (B, S, D), dtype=jnp.float32)
    params = init_params(kp, D, FF_MULT)

    fwd = jax.jit(transformer_block)
    out = jax.block_until_ready(fwd(x, params))

    ref = jax.block_until_ready(reference_forward(x, params))
    assert out.shape == (B, S, D), out.shape
    # Tolerance relaxed vs. pure-f32 because the kernel runs the big matmuls
    # with bf16 operands (f32 accumulation) and uses the approx EUP reciprocal;
    # LayerNorm / softmax / residuals stay f32.
    np.testing.assert_allclose(np.asarray(out), np.asarray(ref), rtol=2e-2, atol=2e-2)

    print("KERNEL_OK")
</pallas_src>

<mosaic_0001>
module attributes {stable_mosaic.version = 11 : i64} {
  func.func @transformer_block_kernel(%arg0: memref<16x32xf32, #tpu.memory_space<vmem>>, %arg1: memref<32x96xbf16, #tpu.memory_space<vmem>>, %arg2: memref<32x32xbf16, #tpu.memory_space<vmem>>, %arg3: memref<32x128xbf16, #tpu.memory_space<vmem>>, %arg4: memref<32x128xbf16, #tpu.memory_space<vmem>>, %arg5: memref<128x32xbf16, #tpu.memory_space<vmem>>, %arg6: memref<136x128xf32, #tpu.memory_space<vmem>>, %arg7: memref<16x32xf32, #tpu.memory_space<vmem>>) attributes {dimension_semantics = [], scalar_prefetch = 0 : i64, scratch_operands = 0 : i64, tpu.core_type = #tpu.core_type<tc>} {
    %c0 = arith.constant 0 : index
    %c0_0 = arith.constant 0 : index
    %0 = vector.load %arg0[%c0, %c0_0] : memref<16x32xf32, #tpu.memory_space<vmem>>, vector<16x32xf32>
    %c0_1 = arith.constant 0 : index
    %c0_2 = arith.constant 0 : index
    %1 = vector.load %arg6[%c0_1, %c0_2] : memref<136x128xf32, #tpu.memory_space<vmem>>, vector<1x96xf32>
    %c8 = arith.constant 8 : index
    %c0_3 = arith.constant 0 : index
    %2 = vector.load %arg6[%c8, %c0_3] : memref<136x128xf32, #tpu.memory_space<vmem>>, vector<1x32xf32>
    %c16 = arith.constant 16 : index
    %c0_4 = arith.constant 0 : index
    %3 = vector.load %arg6[%c16, %c0_4] : memref<136x128xf32, #tpu.memory_space<vmem>>, vector<1x32xf32>
    %c24 = arith.constant 24 : index
    %c0_5 = arith.constant 0 : index
    %4 = vector.load %arg6[%c24, %c0_5] : memref<136x128xf32, #tpu.memory_space<vmem>>, vector<1x32xf32>
    %c32 = arith.constant 32 : index
    %c0_6 = arith.constant 0 : index
    %5 = vector.load %arg6[%c32, %c0_6] : memref<136x128xf32, #tpu.memory_space<vmem>>, vector<1x128xf32>
    %c40 = arith.constant 40 : index
    %c0_7 = arith.constant 0 : index
    %6 = vector.load %arg6[%c40, %c0_7] : memref<136x128xf32, #tpu.memory_space<vmem>>, vector<1x128xf32>
    %c48 = arith.constant 48 : index
    %c0_8 = arith.constant 0 : index
    %7 = vector.load %arg6[%c48, %c0_8] : memref<136x128xf32, #tpu.memory_space<vmem>>, vector<1x32xf32>
    %c56 = arith.constant 56 : index
    %c0_9 = arith.constant 0 : index
    %8 = vector.load %arg6[%c56, %c0_9] : memref<136x128xf32, #tpu.memory_space<vmem>>, vector<1x32xf32>
    %c64 = arith.constant 64 : index
    %c0_10 = arith.constant 0 : index
    %9 = vector.load %arg6[%c64, %c0_10] : memref<136x128xf32, #tpu.memory_space<vmem>>, vector<1x32xf32>
    %c72 = arith.constant 72 : index
    %c0_11 = arith.constant 0 : index
    %10 = vector.load %arg6[%c72, %c0_11] : memref<136x128xf32, #tpu.memory_space<vmem>>, vector<64x64xf32>
    %11 = arith.truncf %0 : vector<16x32xf32> to vector<16x32xbf16>
    %c0_12 = arith.constant 0 : index
    %c0_13 = arith.constant 0 : index
    %12 = vector.load %arg1[%c0_12, %c0_13] : memref<32x96xbf16, #tpu.memory_space<vmem>>, vector<32x96xbf16>
    %cst = arith.constant dense<0.000000e+00> : vector<16x96xf32>
    %13 = tpu.matmul %11, %12, %cst {dimension_numbers = #tpu.dot_dimension_numbers<[1], [0], [0], [1], [0, 0, 1, 1], [], []>} : vector<16x32xbf16>, vector<32x96xbf16>, vector<16x96xf32> -> vector<16x96xf32>
    %14 = vector.broadcast %1 : vector<1x96xf32> to vector<16x96xf32>
    %15 = arith.addf %13, %14 : vector<16x96xf32>
    %16 = vector.extract_strided_slice %15 {offsets = [0, 0], sizes = [16, 32], strides = [1, 1]} : vector<16x96xf32> to vector<16x32xf32>
    %17 = vector.extract_strided_slice %15 {offsets = [0, 32], sizes = [16, 32], strides = [1, 1]} : vector<16x96xf32> to vector<16x32xf32>
    %18 = vector.extract_strided_slice %15 {offsets = [0, 64], sizes = [16, 32], strides = [1, 1]} : vector<16x96xf32> to vector<16x32xf32>
    %19 = vector.extract_strided_slice %16 {offsets = [0, 0], sizes = [16, 8], strides = [1, 1]} : vector<16x32xf32> to vector<16x8xf32>
    %20 = vector.extract_strided_slice %16 {offsets = [0, 8], sizes = [16, 8], strides = [1, 1]} : vector<16x32xf32> to vector<16x8xf32>
    %21 = vector.extract_strided_slice %16 {offsets = [0, 16], sizes = [16, 8], strides = [1, 1]} : vector<16x32xf32> to vector<16x8xf32>
    %22 = vector.extract_strided_slice %16 {offsets = [0, 24], sizes = [16, 8], strides = [1, 1]} : vector<16x32xf32> to vector<16x8xf32>
    %23 = tpu.concatenate %19, %20, %21, %22 in 0 : vector<16x8xf32>, vector<16x8xf32>, vector<16x8xf32>, vector<16x8xf32> -> vector<64x8xf32>
    %24 = vector.extract_strided_slice %17 {offsets = [0, 0], sizes = [16, 8], strides = [1, 1]} : vector<16x32xf32> to vector<16x8xf32>
    %25 = vector.extract_strided_slice %17 {offsets = [0, 8], sizes = [16, 8], strides = [1, 1]} : vector<16x32xf32> to vector<16x8xf32>
    %26 = vector.extract_strided_slice %17 {offsets = [0, 16], sizes = [16, 8], strides = [1, 1]} : vector<16x32xf32> to vector<16x8xf32>
    %27 = vector.extract_strided_slice %17 {offsets = [0, 24], sizes = [16, 8], strides = [1, 1]} : vector<16x32xf32> to vector<16x8xf32>
    %28 = tpu.concatenate %24, %25, %26, %27 in 0 : vector<16x8xf32>, vector<16x8xf32>, vector<16x8xf32>, vector<16x8xf32> -> vector<64x8xf32>
    %29 = vector.extract_strided_slice %18 {offsets = [0, 0], sizes = [16, 8], strides = [1, 1]} : vector<16x32xf32> to vector<16x8xf32>
    %30 = vector.extract_strided_slice %18 {offsets = [0, 8], sizes = [16, 8], strides = [1, 1]} : vector<16x32xf32> to vector<16x8xf32>
    %31 = vector.extract_strided_slice %18 {offsets = [0, 16], sizes = [16, 8], strides = [1, 1]} : vector<16x32xf32> to vector<16x8xf32>
    %32 = vector.extract_strided_slice %18 {offsets = [0, 24], sizes = [16, 8], strides = [1, 1]} : vector<16x32xf32> to vector<16x8xf32>
    %33 = tpu.concatenate %29, %30, %31, %32 in 0 : vector<16x8xf32>, vector<16x8xf32>, vector<16x8xf32>, vector<16x8xf32> -> vector<64x8xf32>
    %cst_14 = arith.constant dense<0.000000e+00> : vector<64x64xf32>
    %34 = tpu.matmul %23, %28, %cst_14 {dimension_numbers = #tpu.dot_dimension_numbers<[1], [1], [0], [0], [0, 0, 1, 0], [], []>} : vector<64x8xf32>, vector<64x8xf32>, vector<64x64xf32> -> vector<64x64xf32>
    %cst_15 = arith.constant 0.353553385 : f32
    %35 = vector.broadcast %cst_15 : f32 to vector<64x64xf32>
    %36 = arith.mulf %34, %35 : vector<64x64xf32>
    %37 = arith.addf %36, %10 : vector<64x64xf32>
    %cst_16 = arith.constant dense<0xFF800000> : vector<64xf32>
    %38 = vector.multi_reduction <maximumf>, %37, %cst_16 [1] : vector<64x64xf32> to vector<64xf32>
    %39 = vector.shape_cast %38 : vector<64xf32> to vector<64x1xf32>
    %40 = vector.broadcast %39 : vector<64x1xf32> to vector<64x64xf32>
    %41 = arith.subf %37, %40 : vector<64x64xf32>
    %42 = math.exp %41 : vector<64x64xf32>
    %cst_17 = arith.constant dense<0.000000e+00> : vector<64xf32>
    %43 = vector.multi_reduction <add>, %42, %cst_17 [1] : vector<64x64xf32> to vector<64xf32>
    %44 = vector.shape_cast %43 : vector<64xf32> to vector<64x1xf32>
    %45 = tpu.reciprocal %44 {approx = true} : vector<64x1xf32> -> vector<64x1xf32>
    %46 = vector.broadcast %45 : vector<64x1xf32> to vector<64x64xf32>
    %47 = arith.mulf %42, %46 : vector<64x64xf32>
    %cst_18 = arith.constant dense<0.000000e+00> : vector<64x8xf32>
    %48 = tpu.matmul %47, %33, %cst_18 {dimension_numbers = #tpu.dot_dimension_numbers<[1], [0], [0], [1], [0, 0, 1, 1], [], []>} : vector<64x64xf32>, vector<64x8xf32>, vector<64x8xf32> -> vector<64x8xf32>
    %c0_19 = arith.constant 0 : index
    %c0_20 = arith.constant 0 : index
    %49 = vector.load %arg2[%c0_19, %c0_20] : memref<32x32xbf16, #tpu.memory_space<vmem>>, vector<32x32xbf16>
    %cst_21 = arith.constant 0.000000e+00 : f32
    %50 = vector.broadcast %cst_21 : f32 to vector<16x32xf32>
    %51 = vector.extract_strided_slice %48 {offsets = [0, 0], sizes = [16, 8], strides = [1, 1]} : vector<64x8xf32> to vector<16x8xf32>
    %52 = arith.truncf %51 : vector<16x8xf32> to vector<16x8xbf16>
    %53 = vector.extract_strided_slice %49 {offsets = [0, 0], sizes = [8, 32], strides = [1, 1]} : vector<32x32xbf16> to vector<8x32xbf16>
    %cst_22 = arith.constant dense<0.000000e+00> : vector<16x32xf32>
    %54 = tpu.matmul %52, %53, %cst_22 {dimension_numbers = #tpu.dot_dimension_numbers<[1], [0], [0], [1], [0, 0, 1, 1], [], []>} : vector<16x8xbf16>, vector<8x32xbf16>, vector<16x32xf32> -> vector<16x32xf32>
    %55 = arith.addf %50, %54 : vector<16x32xf32>
    %56 = vector.extract_strided_slice %48 {offsets = [16, 0], sizes = [16, 8], strides = [1, 1]} : vector<64x8xf32> to vector<16x8xf32>
    %57 = arith.truncf %56 : vector<16x8xf32> to vector<16x8xbf16>
    %58 = vector.extract_strided_slice %49 {offsets = [8, 0], sizes = [8, 32], strides = [1, 1]} : vector<32x32xbf16> to vector<8x32xbf16>
    %cst_23 = arith.constant dense<0.000000e+00> : vector<16x32xf32>
    %59 = tpu.matmul %57, %58, %cst_23 {dimension_numbers = #tpu.dot_dimension_numbers<[1], [0], [0], [1], [0, 0, 1, 1], [], []>} : vector<16x8xbf16>, vector<8x32xbf16>, vector<16x32xf32> -> vector<16x32xf32>
    %60 = arith.addf %55, %59 : vector<16x32xf32>
    %61 = vector.extract_strided_slice %48 {offsets = [32, 0], sizes = [16, 8], strides = [1, 1]} : vector<64x8xf32> to vector<16x8xf32>
    %62 = arith.truncf %61 : vector<16x8xf32> to vector<16x8xbf16>
    %63 = vector.extract_strided_slice %49 {offsets = [16, 0], sizes = [8, 32], strides = [1, 1]} : vector<32x32xbf16> to vector<8x32xbf16>
    %cst_24 = arith.constant dense<0.000000e+00> : vector<16x32xf32>
    %64 = tpu.matmul %62, %63, %cst_24 {dimension_numbers = #tpu.dot_dimension_numbers<[1], [0], [0], [1], [0, 0, 1, 1], [], []>} : vector<16x8xbf16>, vector<8x32xbf16>, vector<16x32xf32> -> vector<16x32xf32>
    %65 = arith.addf %60, %64 : vector<16x32xf32>
    %66 = vector.extract_strided_slice %48 {offsets = [48, 0], sizes = [16, 8], strides = [1, 1]} : vector<64x8xf32> to vector<16x8xf32>
    %67 = arith.truncf %66 : vector<16x8xf32> to vector<16x8xbf16>
    %68 = vector.extract_strided_slice %49 {offsets = [24, 0], sizes = [8, 32], strides = [1, 1]} : vector<32x32xbf16> to vector<8x32xbf16>
    %cst_25 = arith.constant dense<0.000000e+00> : vector<16x32xf32>
    %69 = tpu.matmul %67, %68, %cst_25 {dimension_numbers = #tpu.dot_dimension_numbers<[1], [0], [0], [1], [0, 0, 1, 1], [], []>} : vector<16x8xbf16>, vector<8x32xbf16>, vector<16x32xf32> -> vector<16x32xf32>
    %70 = arith.addf %65, %69 : vector<16x32xf32>
    %71 = vector.broadcast %2 : vector<1x32xf32> to vector<16x32xf32>
    %72 = arith.addf %70, %71 : vector<16x32xf32>
    %73 = arith.addf %0, %72 : vector<16x32xf32>
    %cst_26 = arith.constant dense<0.000000e+00> : vector<16xf32>
    %74 = vector.multi_reduction <add>, %73, %cst_26 [1] : vector<16x32xf32> to vector<16xf32>
    %75 = vector.shape_cast %74 : vector<16xf32> to vector<16x1xf32>
    %cst_27 = arith.constant 3.200000e+01 : f32
    %76 = vector.broadcast %cst_27 : f32 to vector<16x1xf32>
    %77 = arith.divf %75, %76 : vector<16x1xf32>
    %78 = vector.broadcast %77 : vector<16x1xf32> to vector<16x32xf32>
    %79 = arith.subf %73, %78 : vector<16x32xf32>
    %80 = vector.broadcast %77 : vector<16x1xf32> to vector<16x32xf32>
    %81 = arith.subf %73, %80 : vector<16x32xf32>
    %82 = arith.mulf %79, %81 : vector<16x32xf32>
    %cst_28 = arith.constant dense<0.000000e+00> : vector<16xf32>
    %83 = vector.multi_reduction <add>, %82, %cst_28 [1] : vector<16x32xf32> to vector<16xf32>
    %84 = vector.shape_cast %83 : vector<16xf32> to vector<16x1xf32>
    %cst_29 = arith.constant 3.200000e+01 : f32
    %85 = vector.broadcast %cst_29 : f32 to vector<16x1xf32>
    %86 = arith.divf %84, %85 : vector<16x1xf32>
    %87 = vector.broadcast %77 : vector<16x1xf32> to vector<16x32xf32>
    %88 = arith.subf %73, %87 : vector<16x32xf32>
    %cst_30 = arith.constant 9.99999974E-6 : f32
    %89 = vector.broadcast %cst_30 : f32 to vector<16x1xf32>
    %90 = arith.addf %86, %89 : vector<16x1xf32>
    %91 = math.rsqrt %90 : vector<16x1xf32>
    %92 = vector.broadcast %91 : vector<16x1xf32> to vector<16x32xf32>
    %93 = arith.mulf %88, %92 : vector<16x32xf32>
    %94 = vector.broadcast %3 : vector<1x32xf32> to vector<16x32xf32>
    %95 = arith.mulf %93, %94 : vector<16x32xf32>
    %96 = vector.broadcast %4 : vector<1x32xf32> to vector<16x32xf32>
    %97 = arith.addf %95, %96 : vector<16x32xf32>
    %98 = arith.truncf %97 : vector<16x32xf32> to vector<16x32xbf16>
    %c0_31 = arith.constant 0 : index
    %c0_32 = arith.constant 0 : index
    %99 = vector.load %arg3[%c0_31, %c0_32] : memref<32x128xbf16, #tpu.memory_space<vmem>>, vector<32x128xbf16>
    %cst_33 = arith.constant dense<0.000000e+00> : vector<16x128xf32>
    %100 = tpu.matmul %98, %99, %cst_33 {dimension_numbers = #tpu.dot_dimension_numbers<[1], [0], [0], [1], [0, 0, 1, 1], [], []>} : vector<16x32xbf16>, vector<32x128xbf16>, vector<16x128xf32> -> vector<16x128xf32>
    %101 = vector.broadcast %5 : vector<1x128xf32> to vector<16x128xf32>
    %102 = arith.addf %100, %101 : vector<16x128xf32>
    %c0_34 = arith.constant 0 : index
    %c0_35 = arith.constant 0 : index
    %103 = vector.load %arg4[%c0_34, %c0_35] : memref<32x128xbf16, #tpu.memory_space<vmem>>, vector<32x128xbf16>
    %cst_36 = arith.constant dense<0.000000e+00> : vector<16x128xf32>
    %104 = tpu.matmul %98, %103, %cst_36 {dimension_numbers = #tpu.dot_dimension_numbers<[1], [0], [0], [1], [0, 0, 1, 1], [], []>} : vector<16x32xbf16>, vector<32x128xbf16>, vector<16x128xf32> -> vector<16x128xf32>
    %105 = vector.broadcast %6 : vector<1x128xf32> to vector<16x128xf32>
    %106 = arith.addf %104, %105 : vector<16x128xf32>
    %107 = arith.negf %106 : vector<16x128xf32>
    %108 = math.exp %107 : vector<16x128xf32>
    %cst_37 = arith.constant 1.000000e+00 : f32
    %109 = vector.broadcast %cst_37 : f32 to vector<16x128xf32>
    %110 = arith.addf %109, %108 : vector<16x128xf32>
    %111 = arith.divf %109, %110 : vector<16x128xf32>
    %112 = arith.mulf %102, %111 : vector<16x128xf32>
    %113 = arith.truncf %112 : vector<16x128xf32> to vector<16x128xbf16>
    %c0_38 = arith.constant 0 : index
    %c0_39 = arith.constant 0 : index
    %114 = vector.load %arg5[%c0_38, %c0_39] : memref<128x32xbf16, #tpu.memory_space<vmem>>, vector<128x32xbf16>
    %cst_40 = arith.constant dense<0.000000e+00> : vector<16x32xf32>
    %115 = tpu.matmul %113, %114, %cst_40 {dimension_numbers = #tpu.dot_dimension_numbers<[1], [0], [0], [1], [0, 0, 1, 1], [], []>} : vector<16x128xbf16>, vector<128x32xbf16>, vector<16x32xf32> -> vector<16x32xf32>
    %116 = vector.broadcast %7 : vector<1x32xf32> to vector<16x32xf32>
    %117 = arith.addf %115, %116 : vector<16x32xf32>
    %118 = arith.addf %97, %117 : vector<16x32xf32>
    %cst_41 = arith.constant dense<0.000000e+00> : vector<16xf32>
    %119 = vector.multi_reduction <add>, %118, %cst_41 [1] : vector<16x32xf32> to vector<16xf32>
    %120 = vector.shape_cast %119 : vector<16xf32> to vector<16x1xf32>
    %cst_42 = arith.constant 3.200000e+01 : f32
    %121 = vector.broadcast %cst_42 : f32 to vector<16x1xf32>
    %122 = arith.divf %120, %121 : vector<16x1xf32>
    %123 = vector.broadcast %122 : vector<16x1xf32> to vector<16x32xf32>
    %124 = arith.subf %118, %123 : vector<16x32xf32>
    %125 = vector.broadcast %122 : vector<16x1xf32> to vector<16x32xf32>
    %126 = arith.subf %118, %125 : vector<16x32xf32>
    %127 = arith.mulf %124, %126 : vector<16x32xf32>
    %cst_43 = arith.constant dense<0.000000e+00> : vector<16xf32>
    %128 = vector.multi_reduction <add>, %127, %cst_43 [1] : vector<16x32xf32> to vector<16xf32>
    %129 = vector.shape_cast %128 : vector<16xf32> to vector<16x1xf32>
    %cst_44 = arith.constant 3.200000e+01 : f32
    %130 = vector.broadcast %cst_44 : f32 to vector<16x1xf32>
    %131 = arith.divf %129, %130 : vector<16x1xf32>
    %132 = vector.broadcast %122 : vector<16x1xf32> to vector<16x32xf32>
    %133 = arith.subf %118, %132 : vector<16x32xf32>
    %cst_45 = arith.constant 9.99999974E-6 : f32
    %134 = vector.broadcast %cst_45 : f32 to vector<16x1xf32>
    %135 = arith.addf %131, %134 : vector<16x1xf32>
    %136 = math.rsqrt %135 : vector<16x1xf32>
    %137 = vector.broadcast %136 : vector<16x1xf32> to vector<16x32xf32>
    %138 = arith.mulf %133, %137 : vector<16x32xf32>
    %139 = vector.broadcast %8 : vector<1x32xf32> to vector<16x32xf32>
    %140 = arith.mulf %138, %139 : vector<16x32xf32>
    %141 = vector.broadcast %9 : vector<1x32xf32> to vector<16x32xf32>
    %142 = arith.addf %140, %141 : vector<16x32xf32>
    %c0_46 = arith.constant 0 : index
    %c0_47 = arith.constant 0 : index
    %143 = vector.load %arg7[%c0_46, %c0_47] : memref<16x32xf32, #tpu.memory_space<vmem>>, vector<16x32xf32>
    tpu.vector_store %arg7[%c0_46, %c0_47], %142 {strides = array<i32>} : memref<16x32xf32, #tpu.memory_space<vmem>>, vector<16x32xf32>,
    return
  }
}

</mosaic_0001>

<bundles_post_ra>
// kernel: transformer_block.1
= control target key start
LH: loop header
LB: loop body
LE: loop exit
PB: predicated region body
PF: predicated region fallthrough
CT: control target
= control target key end

     0   :  { %v1509_v1 = vmov 0.0   ;;  %vm1510_vm0 = vmmov 0   ;;  %vm68_vm1 = vcmask 261120   ;;  %s1851_s0 = inlined_call_operand.vmem [shape: f32[16,32], index: 0, kind: input, shape index: {}]   ;;  %s1852_s1 = inlined_call_operand.vmem [shape: bf16[32,96], index: 1, kind: input, shape index: {}]   ;;  %s1853_s2 = inlined_call_operand.vmem [shape: bf16[32,32], index: 2, kind: input, shape index: {}]   ;;  %s1854_s3 = inlined_call_operand.vmem [shape: bf16[32,128], index: 3, kind: input, shape index: {}]   ;;  %s1855_s4 = inlined_call_operand.vmem [shape: bf16[32,128], index: 4, kind: input, shape index: {}]   ;;  %s1856_s5 = inlined_call_operand.vmem [shape: bf16[128,32], index: 5, kind: input, shape index: {}]   ;;  %s1857_s6 = inlined_call_operand.vmem [shape: f32[136,128], index: 6, kind: input, shape index: {}]   ;;  %s1858_s7 = inlined_call_operand.hbm [shape: f32[16,32], index: 7, kind: output, shape index: {}]  }
   0x1   :  { %v1423_v0 = vld [vmem:[%s1852_s1] sm:$0xff]   ;;  %1209 = vmatprep.subr.bf16.mxu0 %v1509_v1  ;;  %v1424_v2 = vld [vmem:[%s1852_s1 + $0x8] sm:$0xff]   ;;  %1213 = vmatprep.mubr.msk.bf16.mxu0 %vm1510_vm0, %v1509_v1 }
   0x2   :  { %1210 = vmatpush3.bf16.msra.mxu0 %v1423_v0  ;;  %v1571_v3 = vld [vmem:[%s1851_s0] sm:$0xff]  ;;  %v1576_v4 = vld [vmem:[%s1851_s0 + $0x8] sm:$0xff] }
   0x3   :  { %1211 = vmatprep.subr.bf16.mxu0 %v1509_v1  ;;  %v47_v5 = vpack.c.bf16 %v1576_v4, %v1571_v3 }
   0x6   :  { %1212 = vmatpush3.bf16.msra.mxu0 %v1424_v2 }
   0x9   :  { %1214 = vmatmul.mubr.msk.bf16.vlgmr.msra.gmra.mrb[0].mxu0 %vm68_vm1, %v47_v5 }
   0xa   :  { %12 = vsyncpa [#allocation3], 0  ;;  %v1095_v6 = vld [vmem:[%s1857_s6] ss:$0 sm:$0xff]  ;;  %vm143_vm2 = vcmask 64512   ;;  %s1511_s0 = smov 112  }
   0xb   :  { %s1512_s10 = smov 120   ;;  %s1513_s11 = smov 104   ;;  %vm1600_vm3 = vmpackc.low %vm143_vm2, %vm143_vm2  ;;  %v40_v41 = vld [vmem:[%s1857_s6 + $0x50] sm:$0xff]  ;;  %v39_v44 = vld [vmem:[%s1857_s6 + $0x48] sm:$0xff]  ;;  %vm297_vm4 = vcmask 523264   ;;  %vm548_vm5 = vcmask 1043456  }
   0xc   :  { %s1514_s12 = smov 96   ;;  %v41_v52 = vld [vmem:[%s1857_s6 + $0x58] sm:$0xff]  ;;  %v42_v55 = vld [vmem:[%s1857_s6 + $0x60] sm:$0xff]  ;;  %v43_v60 = vld [vmem:[%s1857_s6 + $0x68] sm:$0xff]  ;;  %s1515_s29 = smov 64  }
   0xd   :  { %v44_v0 = vld [vmem:[%s1857_s6 + $0x70] sm:$0xff] }
  0xdc   :  { %v106_v7 = vpop.f32.mrb[0].mxu0 }
  0xdd   :  { %v107_v8 = vadd.f32 %v1095_v6, %v106_v7  ;;  %v1215_v9 = vpop.f32.mrb[1].mxu0 }
  0xde   :  { %v109_v10 = vpop.f32.mrb[2].mxu0 }
  0xdf   :  { %119 = vrot.lane.b32.xlu1 %v107_v8, %s1511_s0  ;;  %115 = vrot.lane.b32.xlu0 %v107_v8, %s1512_s10  ;;  %v1216_v11 = vpop.f32.mrb[3].mxu0  ;;  %v110_v12 = vadd.f32 %v1095_v6, %v109_v10 }
  0xe0   :  { %1233 = vmatprep.mubr.msk.f32.mxu1 %vm143_vm2, %v107_v8 }
  0xe1   :  { %v1586_v13 = vpack.i.bf16 %v110_v12, %v107_v8 }
  0xe3   :  { %121 = vrot.lane.b32.xlu1 %v110_v12, %s1511_s0  ;;  %117 = vrot.lane.b32.xlu0 %v110_v12, %s1512_s10 }
  0xe7   :  { %125 = vrot.lane.b32.xlu1 %v110_v12, %s1513_s11  ;;  %123 = vrot.lane.b32.xlu0 %v107_v8, %s1513_s11  ;;  %v45_v8 = vld [vmem:[%s1857_s6 + $0x78] sm:$0xff] }
  0xeb   :  { %1384 = vrot.lane.b32.xlu0 %v1586_v13, %s1514_s12 }
 0x151   :  { %v120_v14 = vpop.permute.xlu1 %119  ;;  %v116_v15 = vpop.permute.xlu0 %115 }
 0x155   :  { %v122_v16 = vpop.permute.xlu1 %121  ;;  %v118_v17 = vpop.permute.xlu0 %117 }
 0x156   :  { %v1589_v18 = vpack.i.bf16 %v122_v16, %v120_v14  ;;  %v1591_v19 = vpack.i.bf16 %v118_v17, %v116_v15 }
 0x158   :  { %1394 = vrot.lane.b32.xlu0 %v1589_v18, %s1514_s12  ;;  %1389 = vrot.lane.b32.xlu1 %v1591_v19, %s1514_s12 }
 0x159   :  { %v126_v20 = vpop.permute.xlu1 %125  ;;  %v124_v21 = vpop.permute.xlu0 %123 }
 0x15a   :  { %v1595_v22 = vpack.i.bf16 %v126_v20, %v124_v21 }
 0x15c   :  { %1399 = vrot.lane.b32.xlu1 %v1595_v22, %s1514_s12 }
 0x15d   :  { %v1385_v23 = vpop.permute.xlu0 %1384 }
 0x15e   :  { %v1387_v24 = vunpack.i.h.bf16 %v1385_v23  ;;  %v1386_v25 = vunpack.i.l.bf16 %v1385_v23 }
 0x160   :  { %v1333_v27 = vpack.c.bf16 %v1387_v24, %v1386_v25 }
 0x162   :  { %1335 = vmatprep.subr.msk.bf16.mxu1 %vm1600_vm3, %v1333_v27 }
 0x163   :  { %1338 = vmatpush3.bf16.xpose.msk.msra.mxu1 %vm1600_vm3, %v1333_v27 }
 0x1ca   :  { %v1390_v28 = vpop.permute.xlu1 %1389  ;;  %v1395_v29 = vpop.permute.xlu0 %1394 }
 0x1cb   :  { %v1392_v30 = vunpack.i.h.bf16 %v1390_v28  ;;  %v1391_v31 = vunpack.i.l.bf16 %v1390_v28  ;;  %v1397_v32 = vunpack.i.h.bf16 %v1395_v29  ;;  %v1396_v33 = vunpack.i.l.bf16 %v1395_v29 }
 0x1cd   :  { %v1339_v34 = vpack.c.bf16 %v1392_v30, %v1391_v31  ;;  %v1345_v35 = vpack.c.bf16 %v1397_v32, %v1396_v33 }
 0x1ce   :  { %v1400_v36 = vpop.permute.xlu1 %1399 }
 0x1cf   :  { %1341 = vmatprep.subr.msk.bf16.mxu1 %vm1600_vm3, %v1339_v34  ;;  %v1402_v37 = vunpack.i.h.bf16 %v1400_v36  ;;  %v1401_v38 = vunpack.i.l.bf16 %v1400_v36 }
 0x1d0   :  { %1344 = vmatpush3.bf16.xpose.msk.msra.mxu1 %vm1600_vm3, %v1339_v34 }
 0x1d1   :  { %1347 = vmatprep.subr.msk.bf16.mxu1 %vm1600_vm3, %v1345_v35  ;;  %v1351_v39 = vpack.c.bf16 %v1402_v37, %v1401_v38 }
 0x1d8   :  { %1350 = vmatpush3.bf16.xpose.msk.msra.mxu1 %vm1600_vm3, %v1345_v35 }
 0x1d9   :  { %1353 = vmatprep.subr.msk.bf16.mxu1 %vm1600_vm3, %v1351_v39 }
 0x1e0   :  { %1356 = vmatpush3.bf16.xpose.msk.msra.mxu1 %vm1600_vm3, %v1351_v39 }
 0x1e1   :  { %1297 = vmatprep.subr.bf16.mxu1 %v1509_v1 }
 0x1e7   :  { %1234 = vmatmul.mubr.msk.f32.vlgmr.msra.gmra.mrb[0].mxu1 %vm143_vm2, %v110_v12 }
 0x1e8   :  { %1236 = vmatprep.mubr.msk.f32.mxu1 %vm143_vm2, %v116_v15 }
 0x1eb   :  { %1237 = vmatmul.mubr.msk.f32.gmra.mrb[2].mxu1 %vm143_vm2, %v118_v17 }
 0x1ec   :  { %1239 = vmatprep.mubr.msk.f32.mxu1 %vm143_vm2, %v120_v14  ;;  %v46_v14 = vld [vmem:[%s1857_s6 + $0x80] sm:$0xff] }
 0x1ef   :  { %1240 = vmatmul.mubr.msk.f32.gmra.mrb[4].mxu1 %vm143_vm2, %v122_v16 }
 0x1f0   :  { %1242 = vmatprep.mubr.msk.f32.mxu1 %vm143_vm2, %v124_v21 }
 0x1f3   :  { %1243 = vmatmul.mubr.msk.f32.gmra.mrb[6].mxu1 %vm143_vm2, %v126_v20 }
 0x1f4   :  { %1301 = vmatprep.mubr.msk.bf16.mxu1 %vm1510_vm0, %v1509_v1 }
 0x2ba   :  { %v1235_v40 = vpop.f32.mrb[0].mxu1 }
 0x2bb   :  { %v282_v42 = vmul.f32 0.35355338, %v1235_v40  ;;  %v242_v43 = vpop.f32.mrb[1].mxu1 }
 0x2bc   :  { %v281_v45 = vmul.f32 0.35355338, %v242_v43 }
 0x2bd   :  { %v290_v46 = vadd.f32 %v282_v42, %v40_v41 }
 0x2be   :  { %v1238_v47 = vpop.f32.mrb[2].mxu1  ;;  %v289_v48 = vadd.f32 %v281_v45, %v39_v44 }
 0x2bf   :  { %v284_v49 = vmul.f32 0.35355338, %v1238_v47  ;;  %v252_v50 = vpop.f32.mrb[3].mxu1  ;;  %v301_v51 = vsel %vm297_vm4, %v290_v46, -inf }
 0x2c0   :  { %v283_v53 = vmul.f32 0.35355338, %v252_v50  ;;  %302 = vmax.xlane.f32.xlu1 %v301_v51  ;;  %v298_v54 = vsel %vm297_vm4, %v289_v48, -inf }
 0x2c1   :  { %299 = vmax.xlane.f32.xlu0 %v298_v54  ;;  %v292_v59 = vadd.f32 %v284_v49, %v42_v55 }
 0x2c2   :  { %v1241_v56 = vpop.f32.mrb[4].mxu1  ;;  %v291_v57 = vadd.f32 %v283_v53, %v41_v52 }
 0x2c3   :  { %v262_v58 = vpop.f32.mrb[5].mxu1  ;;  %v286_v61 = vmul.f32 0.35355338, %v1241_v56  ;;  %v307_v7 = vsel %vm297_vm4, %v292_v59, -inf }
 0x2c4   :  { %v285_v62 = vmul.f32 0.35355338, %v262_v58  ;;  %v304_v63 = vsel %vm297_vm4, %v291_v57, -inf }
 0x2c5   :  { %305 = vmax.xlane.f32.xlu0 %v304_v63  ;;  %v294_v12 = vadd.f32 %v286_v61, %v44_v0 }
 0x2c6   :  { %v1244_v2 = vpop.f32.mrb[6].mxu1  ;;  %v1651_v5 = vadd.f32 %v285_v62, %v43_v60 }
 0x2c7   :  { %v272_v6 = vpop.f32.mrb[7].mxu1  ;;  %v288_v9 = vmul.f32 0.35355338, %v1244_v2  ;;  %v313_v16 = vsel %vm297_vm4, %v294_v12, -inf }
 0x2c8   :  { %v287_v10 = vmul.f32 0.35355338, %v272_v6  ;;  %v310_v11 = vsel %vm297_vm4, %v1651_v5, -inf }
 0x2c9   :  { %308 = vmax.xlane.f32.xlu0 %v307_v7  ;;  %311 = vmax.xlane.f32.xlu1 %v310_v11  ;;  %v1667_v20 = vadd.f32 %v288_v9, %v46_v14 }
 0x2ca   :  { %v1662_v15 = vadd.f32 %v287_v10, %v45_v8 }
 0x2cb   :  { %v319_v21 = vsel %vm297_vm4, %v1667_v20, -inf }
 0x2cc   :  { %v316_v17 = vsel %vm297_vm4, %v1662_v15, -inf }
 0x2cd   :  { %314 = vmax.xlane.f32.xlu0 %v313_v16  ;;  %317 = vmax.xlane.f32.xlu1 %v316_v17 }
 0x2d1   :  { %320 = vmax.xlane.f32.xlu0 %v319_v21 }
 0x2de   :  { %1404 = vrot.lane.b32.xlu1 %v1586_v13, %s1515_s29 }
 0x2e7   :  { %1409 = vrot.lane.b32.xlu0 %v1591_v19, %s1515_s29 }
 0x34d   :  { %v303_v23 = vpop.xlane.xlu1 %302 }
 0x34e   :  { %v323_v24 = vsub.f32 %v290_v46, %v303_v23  ;;  %v300_v25 = vpop.xlane.xlu0 %299 }
 0x34f   :  { %v322_v26 = vsub.f32 %v289_v48, %v300_v25 }
 0x350   :  { %v332_v27 = vmul.f32 1.442695, %v323_v24 }
 0x351   :  { %v330_v28 = vmul.f32 1.442695, %v322_v26 }
 0x352   :  { %1437 = vpow2.f32 %v332_v27  ;;  %v306_v29 = vpop.xlane.xlu0 %305 }
 0x353   :  { %1439 = vpow2.f32 %v330_v28  ;;  %v324_v30 = vsub.f32 %v291_v57, %v306_v29 }
 0x355   :  { %v334_v31 = vmul.f32 1.442695, %v324_v30 }
 0x356   :  { %v309_v32 = vpop.xlane.xlu0 %308  ;;  %v312_v33 = vpop.xlane.xlu1 %311 }
 0x357   :  { %1441 = vpow2.f32 %v334_v31  ;;  %v325_v34 = vsub.f32 %v292_v59, %v309_v32  ;;  %v326_v57 = vsub.f32 %v1651_v5, %v312_v33 }
 0x359   :  { %v336_v35 = vmul.f32 1.442695, %v325_v34  ;;  %v338_v58 = vmul.f32 1.442695, %v326_v57 }
 0x35a   :  { %v315_v13 = vpop.xlane.xlu0 %314  ;;  %v318_v36 = vpop.xlane.xlu1 %317 }
 0x35b   :  { %1443 = vpow2.f32 %v336_v35  ;;  %v327_v19 = vsub.f32 %v294_v12, %v315_v13  ;;  %v328_v59 = vsub.f32 %v1662_v15, %v318_v36 }
 0x35c   :  { %v1675_v37 = vpop.eup %1437 }
 0x35d   :  { %v1440_v38 = vpop.eup %1439  ;;  %v340_v39 = vmul.f32 1.442695, %v327_v19  ;;  %v349_v40 = vsel %vm297_vm4, %v1675_v37, 0.0  ;;  %v342_v60 = vmul.f32 1.442695, %v328_v59 }
 0x35e   :  { %350 = vadd.xlane.f32.xlu0 %v349_v40  ;;  %v321_v41 = vpop.xlane.xlu0 %320  ;;  %v1405_v42 = vpop.permute.xlu1 %1404  ;;  %v346_v43 = vsel %vm297_vm4, %v1440_v38, 0.0  ;;  %v540_v40 = vld [vmem:[%s1853_s2 + $0x4] sm:$0xf] }
 0x35f   :  { %1445 = vpow2.f32 %v340_v39  ;;  %v1407_v44 = vunpack.i.h.bf16 %v1405_v42  ;;  %v1406_v45 = vunpack.i.l.bf16 %v1405_v42  ;;  %347 = vadd.xlane.f32.xlu1 %v346_v43  ;;  %v329_v61 = vsub.f32 %v1667_v20, %v321_v41 }
 0x360   :  { %1447 = vpow2.f32 %v338_v58  ;;  %v550_v41 = vsel %vm548_vm5, %v540_v40, 0 }
 0x361   :  { %v1680_v46 = vpop.eup %1441  ;;  %v1357_v47 = vpack.c.bf16 %v1407_v44, %v1406_v45  ;;  %1449 = vpow2.f32 %v342_v60  ;;  %v344_v62 = vmul.f32 1.442695, %v329_v61  ;;  %v539_v45 = vld [vmem:[%s1853_s2] sm:$0xf] }
 0x362   :  { %v1410_v48 = vpop.permute.xlu0 %1409  ;;  %v352_v49 = vsel %vm297_vm4, %v1680_v46, 0.0 }
 0x363   :  { %v1412_v50 = vunpack.i.h.bf16 %v1410_v48  ;;  %v1411_v51 = vunpack.i.l.bf16 %v1410_v48  ;;  %353 = vadd.xlane.f32.xlu1 %v352_v49  ;;  %1358 = vmatprep.subr.bf16.mxu0 %v1357_v47  ;;  %1451 = vpow2.f32 %v344_v62  ;;  %v597_v49 = vsel %vm548_vm5, %v539_v45, 0 }
 0x364   :  { %1360 = vmatpush3.bf16.msra.mxu0 %v1357_v47 }
 0x365   :  { %v1444_v52 = vpop.eup %1443  ;;  %v1361_v53 = vpack.c.bf16 %v1412_v50, %v1411_v51  ;;  %v541_v50 = vld [vmem:[%s1853_s2 + $0x8] sm:$0xf] }
 0x366   :  { %v355_v54 = vsel %vm297_vm4, %v1444_v52, 0.0  ;;  %v645_v51 = vsel %vm548_vm5, %v541_v50, 0 }
 0x367   :  { %356 = vadd.xlane.f32.xlu0 %v355_v54  ;;  %1362 = vmatprep.subr.bf16.mxu0 %v1361_v53 }
 0x368   :  { %1364 = vmatpush3.bf16.msra.mxu0 %v1361_v53 }
 0x369   :  { %v1685_v55 = vpop.eup %1445 }
 0x36a   :  { %v361_v56 = vsel %vm297_vm4, %v1685_v55, 0.0  ;;  %v1448_v63 = vpop.eup %1447 }
 0x36b   :  { %362 = vadd.xlane.f32.xlu0 %v361_v56  ;;  %v358_v0 = vsel %vm297_vm4, %v1448_v63, 0.0  ;;  %v1450_v2 = vpop.eup %1449 }
 0x374   :  { %1414 = vrot.lane.b32.xlu1 %v1589_v18, %s1515_s29  ;;  %v364_v18 = vsel %vm297_vm4, %v1450_v2, 0.0 }
 0x381   :  { %1419 = vrot.lane.b32.xlu0 %v1595_v22, %s1515_s29  ;;  %v1452_v22 = vpop.eup %1451 }
 0x382   :  { %v367_v5 = vsel %vm297_vm4, %v1452_v22, 0.0 }
 0x398   :  { %359 = vadd.xlane.f32.xlu1 %v358_v0 }
 0x39c   :  { %365 = vadd.xlane.f32.xlu1 %v364_v18 }
 0x3a0   :  { %368 = vadd.xlane.f32.xlu1 %v367_v5 }
 0x3eb   :  { %v351_v7 = vpop.xlane.xlu0 %350 }
 0x3ec   :  { %v348_v6 = vpop.xlane.xlu1 %347 }
 0x3ed   :  { %1453 = vrcp.f32 %v348_v6 }
 0x3ee   :  { %1455 = vrcp.f32 %v351_v7 }
 0x3f0   :  { %v354_v8 = vpop.xlane.xlu1 %353 }
 0x3f1   :  { %1457 = vrcp.f32 %v354_v8 }
 0x3f4   :  { %v357_v9 = vpop.xlane.xlu0 %356  ;;  %v1415_v10 = vpop.permute.xlu1 %1414 }
 0x3f5   :  { %v1417_v11 = vunpack.i.h.bf16 %v1415_v10  ;;  %v1416_v12 = vunpack.i.l.bf16 %v1415_v10  ;;  %1459 = vrcp.f32 %v357_v9 }
 0x3f7   :  { %v1454_v14 = vpop.eup %1453  ;;  %v1365_v15 = vpack.c.bf16 %v1417_v11, %v1416_v12 }
 0x3f8   :  { %v363_v16 = vpop.xlane.xlu0 %362  ;;  %v378_v17 = vmul.f32 %v1454_v14, %v1440_v38  ;;  %v1456_v25 = vpop.eup %1455  ;;  %v1127_v14 = vld [vmem:[%s1857_s6 + $0x8] ss:$0 sm:$0xff] }
 0x3f9   :  { %1366 = vmatprep.subr.bf16.mxu0 %v1365_v15  ;;  %v379_v27 = vmul.f32 %v1456_v25, %v1675_v37  ;;  %1461 = vrcp.f32 %v363_v16 }
 0x3fa   :  { %1368 = vmatpush3.bf16.msra.mxu0 %v1365_v15  ;;  %1261 = vmatprep.mubr.msk.f32.mxu0 %vm297_vm4, %v378_v17 }
 0x3fb   :  { %v1458_v26 = vpop.eup %1457 }
 0x3fc   :  { %v1420_v20 = vpop.permute.xlu0 %1419  ;;  %v380_v29 = vmul.f32 %v1458_v26, %v1680_v46 }
 0x3fd   :  { %v1422_v21 = vunpack.i.h.bf16 %v1420_v20  ;;  %v1421_v23 = vunpack.i.l.bf16 %v1420_v20 }
 0x3ff   :  { %v1369_v24 = vpack.c.bf16 %v1422_v21, %v1421_v23  ;;  %v1460_v28 = vpop.eup %1459 }
 0x400   :  { %v381_v30 = vmul.f32 %v1460_v28, %v1444_v52  ;;  %v542_v52 = vld [vmem:[%s1853_s2 + $0xc] sm:$0xf] }
 0x401   :  { %1370 = vmatprep.subr.bf16.mxu0 %v1369_v24  ;;  %v695_v56 = vsel %vm548_vm5, %v542_v52, 0  ;;  %v1129_v52 = vld [vmem:[%s1857_s6 + $0x18] ss:$0 sm:$0xff] }
 0x402   :  { %1372 = vmatpush3.bf16.msra.mxu0 %v1369_v24 }
 0x403   :  { %1273 = vmatprep.subr.bf16.mxu0 %v1509_v1  ;;  %v1462_v34 = vpop.eup %1461 }
 0x404   :  { %v383_v36 = vmul.f32 %v1462_v34, %v1685_v55 }
 0x405   :  { %1262 = vmatmul.mubr.msk.f32.vlgmr.msra.gmra.mrb[4].mxu0 %vm297_vm4, %v379_v27 }
 0x406   :  { %1264 = vmatprep.mubr.msk.f32.mxu0 %vm297_vm4, %v380_v29  ;;  %1274 = vmatpush3.bf16.msra.mxu0 %v550_v41 }
 0x407   :  { %1279 = vmatprep.subr.bf16.mxu0 %v1509_v1 }
 0x409   :  { %1265 = vmatmul.mubr.msk.f32.gmra.mrb[6].mxu0 %vm297_vm4, %v381_v30 }
 0x425   :  { %v360_v31 = vpop.xlane.xlu1 %359 }
 0x426   :  { %1463 = vrcp.f32 %v360_v31 }
 0x429   :  { %v366_v32 = vpop.xlane.xlu1 %365 }
 0x42a   :  { %1465 = vrcp.f32 %v366_v32 }
 0x42d   :  { %v369_v33 = vpop.xlane.xlu1 %368 }
 0x42e   :  { %1467 = vrcp.f32 %v369_v33 }
 0x430   :  { %v1464_v35 = vpop.eup %1463 }
 0x431   :  { %v382_v13 = vmul.f32 %v1464_v35, %v1448_v63 }
 0x433   :  { %1267 = vmatprep.mubr.msk.f32.mxu0 %vm297_vm4, %v382_v13 }
 0x434   :  { %v1466_v19 = vpop.eup %1465  ;;  %1268 = vmatmul.mubr.msk.f32.gmra.mrb[8].mxu0 %vm297_vm4, %v383_v36 }
 0x435   :  { %v384_v37 = vmul.f32 %v1466_v19, %v1450_v2 }
 0x437   :  { %1270 = vmatprep.mubr.msk.f32.mxu0 %vm297_vm4, %v384_v37  ;;  %v1426_v37 = vld [vmem:[%s1854_s3] sm:$0xff]  }
 0x438   :  { %v1468_v38 = vpop.eup %1467  ;;  %1298 = vmatpush3.bf16.msra.mxu1 %v1426_v37 }
 0x439   :  { %v385_v39 = vmul.f32 %v1468_v38, %v1452_v22  ;;  %1299 = vmatprep.subr.bf16.mxu1 %v1509_v1  ;;  %v1427_v38 = vld [vmem:[%s1855_s4 + $0x8] sm:$0xff]  }
 0x43b   :  { %1271 = vmatmul.mubr.msk.f32.gmra.mrb[10].mxu0 %vm297_vm4, %v385_v39  ;;  %v1428_v39 = vld [vmem:[%s1854_s3 + $0x8] sm:$0xff]  }
 0x43c   :  { %1275 = vmatprep.mubr.msk.bf16.mxu0 %vm1510_vm0, %v1509_v1  ;;  %1300 = vmatpush3.bf16.msra.mxu1 %v1428_v39 }
 0x43d   :  { %1313 = vmatprep.subr.bf16.mxu1 %v1509_v1 }
 0x4d8   :  { %v1263_v42 = vpop.f32.mrb[4].mxu0 }
 0x4d9   :  { %v500_v43 = vpop.f32.mrb[5].mxu0 }
 0x4da   :  { %v543_v44 = vpack.c.bf16 %v1263_v42, %v500_v43 }
 0x4dc   :  { %v1266_v46 = vpop.f32.mrb[6].mxu0 }
 0x4dd   :  { %v510_v47 = vpop.f32.mrb[7].mxu0 }
 0x4de   :  { %v544_v48 = vpack.c.bf16 %v1266_v46, %v510_v47 }
 0x4e0   :  { %1276 = vmatmul.mubr.msk.bf16.vlgmr.msra.gmra.mrb[12].mxu0 %vm143_vm2, %v544_v48  ;;  %v1128_v48 = vld [vmem:[%s1857_s6 + $0x10] ss:$0 sm:$0xff] }
 0x4e1   :  { %1280 = vmatpush3.bf16.msra.mxu0 %v597_v49  ;;  %1281 = vmatprep.mubr.msk.bf16.mxu0 %vm1510_vm0, %v1509_v1 }
 0x4e2   :  { %1285 = vmatprep.subr.bf16.mxu0 %v1509_v1 }
 0x4e8   :  { %1282 = vmatmul.mubr.msk.bf16.vlgmr.msra.gmra.mrb[16].mxu0 %vm143_vm2, %v543_v44 }
 0x4e9   :  { %1286 = vmatpush3.bf16.msra.mxu0 %v645_v51  ;;  %1287 = vmatprep.mubr.msk.bf16.mxu0 %vm1510_vm0, %v1509_v1 }
 0x4ea   :  { %1291 = vmatprep.subr.bf16.mxu0 %v1509_v1 }
 0x507   :  { %v1269_v53 = vpop.f32.mrb[8].mxu0 }
 0x508   :  { %v520_v54 = vpop.f32.mrb[9].mxu0 }
 0x509   :  { %v640_v55 = vpack.c.bf16 %v1269_v53, %v520_v54 }
 0x50b   :  { %1288 = vmatmul.mubr.msk.bf16.vlgmr.msra.gmra.mrb[20].mxu0 %vm143_vm2, %v640_v55 }
 0x50c   :  { %1292 = vmatpush3.bf16.msra.mxu0 %v695_v56  ;;  %1293 = vmatprep.mubr.msk.bf16.mxu0 %vm1510_vm0, %v1509_v1 }
 0x50d   :  { %1305 = vmatprep.subr.bf16.mxu0 %v1509_v1 }
 0x50e   :  { %v1272_v57 = vpop.f32.mrb[10].mxu0 }
 0x50f   :  { %v530_v58 = vpop.f32.mrb[11].mxu0 }
 0x510   :  { %v690_v59 = vpack.c.bf16 %v1272_v57, %v530_v58  ;;  %v1429_v57 = vld [vmem:[%s1856_s5] sm:$0xff]   ;;  %v1430_v58 = vld [vmem:[%s1856_s5 + $0x8] sm:$0xff]  }
 0x513   :  { %1294 = vmatmul.mubr.msk.bf16.vlgmr.msra.gmra.mrb[24].mxu0 %vm143_vm2, %v690_v59  ;;  %v1431_v59 = vld [vmem:[%s1856_s5 + $0x10] sm:$0xff]  }
 0x514   :  { %1309 = vmatprep.mubr.msk.bf16.mxu0 %vm1510_vm0, %v1509_v1 }
 0x5b3   :  { %v586_v60 = vpop.f32.mrb[12].mxu0 }
 0x5b4   :  { %v1277_v61 = vpop.f32.mrb[13].mxu0 }
 0x5b5   :  { %v589_v62 = vpop.f32.mrb[14].mxu0  ;;  %v1433_v61 = vld [vmem:[%s1856_s5 + $0x20] sm:$0xff]  }
 0x5b6   :  { %v1278_v63 = vpop.f32.mrb[15].mxu0 }
 0x5b7   :  { %v1435_v63 = vld [vmem:[%s1856_s5 + $0x30] sm:$0xff]  }
 0x5bb   :  { %v633_v0 = vpop.f32.mrb[16].mxu0 }
 0x5bc   :  { %v634_v2 = vadd.f32 %v633_v0, %v586_v60  ;;  %v1283_v18 = vpop.f32.mrb[17].mxu0  ;;  %v1432_v60 = vld [vmem:[%s1856_s5 + $0x18] sm:$0xff]  }
 0x5bd   :  { %v636_v22 = vpop.f32.mrb[18].mxu0  ;;  %v1436_v0 = vld [vmem:[%s1856_s5 + $0x38] sm:$0xff]  }
 0x5be   :  { %v637_v5 = vadd.f32 %v636_v22, %v589_v62  ;;  %v1284_v6 = vpop.f32.mrb[19].mxu0  ;;  %v1434_v62 = vld [vmem:[%s1856_s5 + $0x28] sm:$0xff]  }
 0x5de   :  { %v681_v7 = vpop.f32.mrb[20].mxu0 }
 0x5df   :  { %v688_v8 = vadd.f32 %v681_v7, %v634_v2  ;;  %v1289_v9 = vpop.f32.mrb[21].mxu0  ;;  %v1134_v2 = vld [vmem:[%s1857_s6 + $0x28] ss:$0 sm:$0xff] }
 0x5e0   :  { %v684_v10 = vpop.f32.mrb[22].mxu0 }
 0x5e1   :  { %v689_v11 = vadd.f32 %v684_v10, %v637_v5  ;;  %v1290_v12 = vpop.f32.mrb[23].mxu0 }
 0x5e6   :  { %v731_v15 = vpop.f32.mrb[24].mxu0 }
 0x5e7   :  { %v738_v16 = vadd.f32 %v731_v15, %v688_v8  ;;  %v1295_v17 = vpop.f32.mrb[25].mxu0 }
 0x5e8   :  { %v734_v20 = vpop.f32.mrb[26].mxu0 }
 0x5e9   :  { %v744_v21 = vadd.f32 %v1127_v14, %v738_v16  ;;  %v739_v23 = vadd.f32 %v734_v20, %v689_v11  ;;  %v1296_v24 = vpop.f32.mrb[27].mxu0 }
 0x5eb   :  { %v745_v25 = vadd.f32 %v1127_v14, %v739_v23  ;;  %v746_v26 = vadd.f32 %v744_v21, %v1571_v3  ;;  %v1130_v21 = vld [vmem:[%s1857_s6 + $0x20] ss:$0 sm:$0xff] }
 0x5ed   :  { %v748_v27 = vsel %vm68_vm1, %v746_v26, 0.0  ;;  %v747_v28 = vadd.f32 %v745_v25, %v1576_v4  ;;  %v1425_v4 = vld [vmem:[%s1855_s4] sm:$0xff]   ;;  %s1516_s4 = smov [#allocation2]  }
 0x5ee   :  { %749 = vadd.xlane.f32.xlu1 %v748_v27  ;;  %1306 = vmatpush3.bf16.msra.mxu0 %v1425_v4  ;;  %s1084_s3 = sshll.u32 %s1516_s4, 4  ;;  %s1085_s3 = int_to_ptr.vmem [resolvable:$true] %s1084_s3 }
 0x5ef   :  { %v751_v29 = vsel %vm68_vm1, %v747_v28, 0.0  ;;  %1307 = vmatprep.subr.bf16.mxu0 %v1509_v1  ;;  %s1485_s23 = scalar_lea.vmem %s1085_s3, 256  ;;  %p1490_p1 = scmp.lt.s32.totalorder %s1085_s3, %s1085_s3 }
 0x5f0   :  { %p1486_p0 = scmp.ne.s32.totalorder %s1085_s3, %s1485_s23  ;;  %p1491_p2 = scmp.lt.s32.totalorder %s1485_s23, %s1485_s23 }
 0x5f2   :  { %752 = vadd.xlane.f32.xlu1 %v751_v29  ;;  %1308 = vmatpush3.bf16.msra.mxu0 %v1427_v38  ;;  %p1492_p3 = por %p1491_p2, %p1490_p1 }
 0x5f4   :  { %p1493_p4 = pnand %p1492_p3, %p1486_p0 }
 0x67b   :  { %v750_v30 = vpop.xlane.xlu1 %749 }
 0x67c   :  { %v755_v31 = vmul.f32 0.03125, %v750_v30  ;;  %v1140_v30 = vld [vmem:[%s1857_s6 + $0x30] ss:$0 sm:$0xff] }
 0x67e   :  { %v757_v32 = vsub.f32 %v746_v26, %v755_v31 }
 0x67f   :  { %v753_v33 = vpop.xlane.xlu1 %752 }
 0x680   :  { %v756_v34 = vmul.f32 0.03125, %v753_v33  ;;  %v759_v35 = vmul.f32 %v757_v32, %v757_v32 }
 0x682   :  { %v758_v13 = vsub.f32 %v747_v28, %v756_v34  ;;  %v761_v36 = vsel %vm68_vm1, %v759_v35, 0.0 }
 0x683   :  { %762 = vadd.xlane.f32.xlu1 %v761_v36 }
 0x684   :  { %v760_v19 = vmul.f32 %v758_v13, %v758_v13 }
 0x686   :  { %v764_v3 = vsel %vm68_vm1, %v760_v19, 0.0 }
 0x687   :  { %765 = vadd.xlane.f32.xlu1 %v764_v3 }
 0x710   :  { %v763_v40 = vpop.xlane.xlu1 %762 }
 0x711   :  { %v767_v41 = vmul.f32 0.03125, %v763_v40 }
 0x713   :  { %v769_v42 = vadd.f32 1e-05, %v767_v41 }
 0x714   :  { %v766_v43 = vpop.xlane.xlu1 %765 }
 0x715   :  { %1469 = vrsqrt.f32 %v769_v42  ;;  %v768_v44 = vmul.f32 0.03125, %v766_v43 }
 0x717   :  { %v770_v45 = vadd.f32 1e-05, %v768_v44 }
 0x719   :  { %1471 = vrsqrt.f32 %v770_v45 }
 0x71f   :  { %v1470_v46 = vpop.eup %1469 }
 0x720   :  { %v773_v47 = vmul.f32 %v1470_v46, %v757_v32 }
 0x722   :  { %v779_v50 = vmul.f32 %v1128_v48, %v773_v47 }
 0x723   :  { %v1472_v49 = vpop.eup %1471 }
 0x724   :  { %v774_v51 = vmul.f32 %v1472_v49, %v758_v13  ;;  %v1775_v54 = vadd.f32 %v1129_v52, %v779_v50 }
 0x726   :  { %v780_v53 = vmul.f32 %v1128_v48, %v774_v51 }
 0x728   :  { %v1777_v55 = vadd.f32 %v1129_v52, %v780_v53 }
 0x72a   :  { %v787_v56 = vpack.c.bf16 %v1777_v55, %v1775_v54 }
 0x72c   :  { %1302 = vmatmul.mubr.msk.bf16.vlgmr.msra.gmra.mrb[8].mxu1 %vm68_vm1, %v787_v56  ;;  %1310 = vmatmul.mubr.msk.bf16.vlgmr.msra.gmra.mrb[28].mxu0 %vm68_vm1, %v787_v56  ;;  %v1150_v56 = vld [vmem:[%s1857_s6 + $0x40] ss:$0 sm:$0xff] }
 0x72d   :  { %1329 = vmatprep.mubr.msk.bf16.mxu1 %vm1510_vm0, %v1509_v1  ;;  %1314 = vmatpush3.bf16.msra.mxu1 %v1429_v57 }
 0x72e   :  { %1315 = vmatprep.subr.bf16.mxu1 %v1509_v1 }
 0x731   :  { %1316 = vmatpush3.bf16.msra.mxu1 %v1430_v58 }
 0x732   :  { %1317 = vmatprep.subr.bf16.mxu1 %v1509_v1 }
 0x735   :  { %1318 = vmatpush3.bf16.msra.mxu1 %v1431_v59 }
 0x736   :  { %1319 = vmatprep.subr.bf16.mxu1 %v1509_v1 }
 0x739   :  { %1320 = vmatpush3.bf16.msra.mxu1 %v1432_v60 }
 0x73a   :  { %1321 = vmatprep.subr.bf16.mxu1 %v1509_v1 }
 0x73d   :  { %1322 = vmatpush3.bf16.msra.mxu1 %v1433_v61 }
 0x73e   :  { %1323 = vmatprep.subr.bf16.mxu1 %v1509_v1 }
 0x741   :  { %1324 = vmatpush3.bf16.msra.mxu1 %v1434_v62 }
 0x742   :  { %1325 = vmatprep.subr.bf16.mxu1 %v1509_v1 }
 0x745   :  { %1326 = vmatpush3.bf16.msra.mxu1 %v1435_v63 }
 0x746   :  { %1327 = vmatprep.subr.bf16.mxu1 %v1509_v1 }
 0x749   :  { %1328 = vmatpush3.bf16.msra.mxu1 %v1436_v0 }
 0x7ff   :  { %v845_v18 = vpop.f32.mrb[8].mxu1  ;;  %v906_v22 = vpop.f32.mrb[28].mxu0 }
 0x800   :  { %v907_v5 = vadd.f32 %v1134_v2, %v906_v22  ;;  %v1303_v6 = vpop.f32.mrb[9].mxu1  ;;  %v1311_v7 = vpop.f32.mrb[29].mxu0  ;;  %v846_v23 = vadd.f32 %v1130_v21, %v845_v18 }
 0x801   :  { %v848_v8 = vpop.f32.mrb[10].mxu1  ;;  %v909_v9 = vpop.f32.mrb[30].mxu0 }
 0x802   :  { %v1138_v10 = vmul.f32 -1.442695, %v907_v5  ;;  %v910_v11 = vadd.f32 %v1134_v2, %v909_v9  ;;  %v1304_v12 = vpop.f32.mrb[11].mxu1  ;;  %v1312_v14 = vpop.f32.mrb[31].mxu0  ;;  %v849_v25 = vadd.f32 %v1130_v21, %v848_v8 }
 0x804   :  { %1473 = vpow2.f32 %v1138_v10  ;;  %v1139_v15 = vmul.f32 -1.442695, %v910_v11 }
 0x806   :  { %1475 = vpow2.f32 %v1139_v15 }
 0x80e   :  { %v1474_v1 = vpop.eup %1473 }
 0x80f   :  { %v919_v16 = vadd.f32 1.0, %v1474_v1 }
 0x810   :  { %v1476_v17 = vpop.eup %1475 }
 0x811   :  { %1477 = vrcp.f32 %v919_v16  ;;  %v920_v20 = vadd.f32 1.0, %v1476_v17 }
 0x813   :  { %1479 = vrcp.f32 %v920_v20 }
 0x81b   :  { %v1478_v24 = vpop.eup %1477 }
 0x81c   :  { %v925_v26 = vmul.f32 %v1478_v24, %v846_v23 }
 0x81d   :  { %v1480_v27 = vpop.eup %1479 }
 0x81e   :  { %v926_v28 = vmul.f32 %v1480_v27, %v849_v25 }
 0x820   :  { %v927_v29 = vpack.c.bf16 %v926_v28, %v925_v26 }
 0x822   :  { %1330 = vmatmul.mubr.bf16.vlgmr.msra.gmra.mrb[12].mxu1 %v927_v29 }
 0x8f5   :  { %v1030_v31 = vpop.f32.mrb[12].mxu1 }
 0x8f6   :  { %v1031_v32 = vadd.f32 %v1140_v30, %v1030_v31  ;;  %v1331_v33 = vpop.f32.mrb[13].mxu1 }
 0x8f7   :  { %v1033_v34 = vpop.f32.mrb[14].mxu1 }
 0x8f8   :  { %v1034_v35 = vadd.f32 %v1140_v30, %v1033_v34  ;;  %v1332_v13 = vpop.f32.mrb[15].mxu1  ;;  %v1037_v36 = vadd.f32 %v1031_v32, %v1775_v54  ;;  %v1149_v54 = vld [vmem:[%s1857_s6 + $0x38] ss:$0 sm:$0xff] }
 0x8fa   :  { %v1039_v19 = vsel %vm68_vm1, %v1037_v36, 0.0  ;;  %v1038_v3 = vadd.f32 %v1034_v35, %v1777_v55 }
 0x8fb   :  { %1040 = vadd.xlane.f32.xlu0 %v1039_v19 }
 0x8fc   :  { %v1042_v4 = vsel %vm68_vm1, %v1038_v3, 0.0 }
 0x8fd   :  { %1043 = vadd.xlane.f32.xlu1 %v1042_v4 }
 0x988   :  { %v1041_v37 = vpop.xlane.xlu0 %1040 }
 0x989   :  { %v1045_v38 = vmul.f32 0.03125, %v1041_v37 }
 0x98a   :  { %v1044_v39 = vpop.xlane.xlu1 %1043 }
 0x98b   :  { %v1047_v40 = vsub.f32 %v1037_v36, %v1045_v38  ;;  %v1046_v41 = vmul.f32 0.03125, %v1044_v39 }
 0x98d   :  { %v1048_v42 = vsub.f32 %v1038_v3, %v1046_v41  ;;  %v1049_v43 = vmul.f32 %v1047_v40, %v1047_v40 }
 0x98f   :  { %v1051_v44 = vsel %vm68_vm1, %v1049_v43, 0.0  ;;  %v1050_v45 = vmul.f32 %v1048_v42, %v1048_v42 }
 0x990   :  { %1052 = vadd.xlane.f32.xlu1 %v1051_v44 }
 0x991   :  { %v1054_v46 = vsel %vm68_vm1, %v1050_v45, 0.0 }
 0x994   :  { %1055 = vadd.xlane.f32.xlu1 %v1054_v46 }
 0xa1d   :  { %v1053_v47 = vpop.xlane.xlu1 %1052 }
 0xa1e   :  { %v1057_v48 = vmul.f32 0.03125, %v1053_v47 }
 0xa20   :  { %v1059_v49 = vadd.f32 1e-05, %v1057_v48 }
 0xa21   :  { %v1056_v50 = vpop.xlane.xlu1 %1055 }
 0xa22   :  { %1481 = vrsqrt.f32 %v1059_v49  ;;  %v1058_v51 = vmul.f32 0.03125, %v1056_v50 }
 0xa24   :  { %v1060_v52 = vadd.f32 1e-05, %v1058_v51 }
 0xa26   :  { %1483 = vrsqrt.f32 %v1060_v52 }
 0xa2c   :  { %v1482_v53 = vpop.eup %1481 }
 0xa2d   :  { %v1063_v55 = vmul.f32 %v1482_v53, %v1047_v40 }
 0xa2f   :  { %v1069_v57 = vmul.f32 %v1149_v54, %v1063_v55 }
 0xa30   :  { %v1484_v58 = vpop.eup %1483 }
 0xa31   :  { %v1064_v59 = vmul.f32 %v1484_v58, %v1048_v42  ;;  %v1075_v60 = vadd.f32 %v1150_v56, %v1069_v57 }
 0xa33   :  { %v1070_v61 = vmul.f32 %v1149_v54, %v1064_v59  ;;  %1077 = vst.msk [vmem:[#allocation2] sm:$0xff] %vm68_vm1, %v1075_v60 }
 0xa35   :  { %v1076_v62 = vadd.f32 %v1150_v56, %v1070_v61 }
 0xa37   :  { %1078 = vst.msk [vmem:[#allocation2 + $0x8] sm:$0xff] %vm68_vm1, %v1076_v62 }
 0xa38   :  { %1496 = shalt.err (!%p1493_p4)
}
 0xa39   :  { %s1497_s25 = scalar_lea.hbm %s1858_s7, 256 }
 0xa3a   :  { %p1498_p5 = scmp.ne.s32.totalorder %s1858_s7, %s1497_s25  ;;  %p1501_p6 = scmp.lt.u32.totalorder %s1497_s25, %s1858_s7 }
 0xa3c   :  { %p1503_p7 = pnand %p1501_p6, %p1498_p5 }
 0xa3e   :  { %1506 = shalt.err (!%p1503_p7)
}
 0xa3f   :  { %s1517_s30 = smov 128   ;;  %s1518_s8 = smov 8  }
 0xa40   :  { %1090 = dma.vmem_to_hbm [thread:$0]  %s1085_s3, 256, %s1858_s7, [#allocation3], %s1517_s30, %s1517_s30, %s1518_s8  }
 0xa41   :  { %1507 = dma.done.wait [#allocation3], 256  }
 0xa42   :  { %1508 = vsyncadd [#allocation3], 4294967040 }
 0xa43   :  { %1094 = vsyncpa [#allocation3], 1 }

</bundles_post_ra>
